<compile_context>
chip_gen: v6e
topology: v6e:2x2x1
jax: 0.10.0
libtpu: 0.0.40
codegen_flags: <defaults>
</compile_context>

<pallas_src>
import functools

import jax
import jax.numpy as jnp
from jax.experimental import pallas as pl
from jax.experimental.pallas import tpu as pltpu

_LANE = 128      # vreg lane width (last dim)
_SUBLANE = 8     # vreg sublane width (second-to-last dim)

_FUSED_WEIGHT_BUDGET = 36 << 20   # keep all 3 weights VMEM-resident below this
_ACT_VMEM_BUDGET = 16 << 20       # budget for streamed activation tiles
_VMEM_FLOOR = 32 << 20            # never request less scoped VMEM than this
_VMEM_CEIL = 56 << 20             # stay under v7x's 64 MiB physical VMEM


def _round_up(n, m):
    return ((n + m - 1) // m) * m


def _vmem_limit(need_bytes):
    need = int(need_bytes * 1.25) + (2 << 20)      # 25% + 2 MiB headroom
    return int(min(max(need, _VMEM_FLOOR), _VMEM_CEIL))


def _pick_tile(dim, cap=512):
    """Largest multiple of 128 <= cap dividing dim (dim is a multiple of 128)."""
    t = max(_LANE, min(dim, (cap // _LANE) * _LANE))
    while dim % t != 0:
        t -= _LANE
    return t


def _choose_tb(batch, row_bytes, budget):
    """Batch tile: multiple of 8, split across 2 TCs, capped by VMEM budget."""
    tb = _round_up(max(int(batch), 1), _SUBLANE)
    if tb >= 2 * _SUBLANE:
        # >= 2 grid steps so both TensorCores of a megacore (v7x) get work.
        tb = _round_up(-(-batch // 2), _SUBLANE)
    max_rows = max(_SUBLANE, (budget // max(int(row_bytes), 1))
                   // _SUBLANE * _SUBLANE)
    tb = min(tb, max_rows, 2048)
    if tb >= 512:
        tb = (tb // 256) * 256    # align M to the MXU height for big batches
    return max(tb, _SUBLANE)


_HAS_BUFFERED = hasattr(pl, "Buffered")


def _resident_spec(shape):
    """VMEM-resident input (constant index_map), single-buffered if supported."""
    idx = lambda i: (0,) * len(shape)
    if _HAS_BUFFERED:
        try:
            return pl.BlockSpec(shape, idx, pipeline_mode=pl.Buffered(1))
        except TypeError:
            pass
    return pl.BlockSpec(shape, idx)


# --------------------------- kernels ---------------------------------------


def _fused_kernel(x_ref, w1_ref, b1_ref, w2_ref, b2_ref, w3_ref, b3_ref,
                  out_ref, *, skip_flags, mxu_dtype):
    """Fused 3 x (Linear -> ReLU) with statically resolved skip connections."""

    def layer(x_mxu, w_ref, b_ref):
        h = jnp.dot(x_mxu, w_ref[...], preferred_element_type=jnp.float32)
        return jnp.maximum(h + b_ref[...], 0.0)   # f32 bias/ReLU on the VPU

    x_in = x_ref[...]                              # streamed dtype (bf16 or f32)
    out = layer(x_in.astype(mxu_dtype), w1_ref, b1_ref)
    x = out + x_in.astype(jnp.float32) if skip_flags[0] else out
    out = layer(x.astype(mxu_dtype), w2_ref, b2_ref)
    x = out + x if skip_flags[1] else out
    out = layer(x.astype(mxu_dtype), w3_ref, b3_ref)
    # PyTorch forward returns `out` (not out + x) after the last layer.
    out_ref[...] = out.astype(out_ref.dtype)


def _layer_kernel(x_ref, w_ref, b_ref, o_ref, acc_ref):
    """One tiled Linear+ReLU layer (large-D fallback), no residual."""
    k = pl.program_id(2)

    @pl.when(k == 0)
    def _():
        acc_ref[...] = jnp.zeros_like(acc_ref)

    acc_ref[...] += jnp.dot(x_ref[...], w_ref[...],
                            preferred_element_type=jnp.float32)

    @pl.when(k == pl.num_programs(2) - 1)
    def _():
        o_ref[...] = jnp.maximum(acc_ref[...] + b_ref[...], 0.0
                                 ).astype(o_ref.dtype)


def _layer_kernel_res(x_ref, w_ref, b_ref, res_ref, o_ref, acc_ref):
    """One tiled Linear+ReLU layer (large-D fallback) with residual add."""
    k = pl.program_id(2)

    @pl.when(k == 0)
    def _():
        acc_ref[...] = jnp.zeros_like(acc_ref)

    acc_ref[...] += jnp.dot(x_ref[...], w_ref[...],
                            preferred_element_type=jnp.float32)

    @pl.when(k == pl.num_programs(2) - 1)
    def _():
        o_ref[...] = (jnp.maximum(acc_ref[...] + b_ref[...], 0.0)
                      + res_ref[...].astype(jnp.float32)).astype(o_ref.dtype)


# --------------------------- wrapper ----------------------------------------


class PallasDummySkipConnectionNetwork:
    """Pallas port of DummySkipConnectionNetwork.

    params: list of 3 (W, b) with PyTorch nn.Linear layout W: [out, in], b: [out].
    Weight preprocessing (transpose / zero-pad to 128 lanes / cast) is hoisted
    into __init__; the pad + pallas_call + slice hot path is jitted and cached.
    NOTE: mxu_dtype defaults to bfloat16 (f32 accumulate) -- a deliberate
    precision trade-off; pass mxu_dtype=jnp.float32 for strict f32.
    """

    def __init__(self, params, use_shortcut=True, *,
                 mxu_dtype=jnp.bfloat16, out_dtype=jnp.float32,
                 force_per_layer=False):
        assert len(params) == 3
        ws = [jnp.asarray(w) for (w, _) in params]
        dims = [int(ws[0].shape[1])] + [int(w.shape[0]) for w in ws]
        self.dims = dims
        self.use_shortcut = bool(use_shortcut)
        # Skip decisions from the ORIGINAL (unpadded) shapes: x.shape == out.shape.
        self.skip_flags = tuple(self.use_shortcut and dims[i] == dims[i + 1]
                                for i in range(3))
        self.pdims = [_round_up(d, _LANE) for d in dims]
        self.mxu_dtype = jnp.dtype(mxu_dtype)
        self.out_dtype = jnp.dtype(out_dtype)
        # Activations stream in the MXU dtype when bf16 (halves DMA), else f32.
        self.io_dtype = (jnp.dtype(jnp.bfloat16)
                         if self.mxu_dtype == jnp.dtype(jnp.bfloat16)
                         else jnp.dtype(jnp.float32))

        wts, bs = [], []
        for li, (w, b) in enumerate(params):
            wt = jnp.asarray(w, jnp.float32).T                    # [in, out]
            wt = jnp.pad(wt, ((0, self.pdims[li] - dims[li]),
                              (0, self.pdims[li + 1] - dims[li + 1])))
            wts.append(wt.astype(self.mxu_dtype))
            bb = jnp.pad(jnp.asarray(b, jnp.float32),
                         (0, self.pdims[li + 1] - dims[li + 1]))
            bs.append(bb[None, :])
        self._wts = tuple(jax.device_put(w) for w in wts)
        self._bs = tuple(jax.device_put(b) for b in bs)

        w_item = self.mxu_dtype.itemsize
        self._weight_bytes = sum(self.pdims[i] * self.pdims[i + 1]
                                 for i in range(3)) * w_item
        # Large-D fallback (important on v7x's 64 MiB VMEM): if the resident
        # weights don't fit comfortably, run three tiled per-layer calls.
        self._fused = (not force_per_layer) and (
            self._weight_bytes <= _FUSED_WEIGHT_BUDGET)
        self._jit_forward = jax.jit(self._forward)

    def __call__(self, x):
        return self._jit_forward(jnp.asarray(x), self._wts, self._bs)

    # ---- traced forward ----

    def _forward(self, x, wts, bs):
        assert x.ndim == 2 and x.shape[1] == self.dims[0]
        if self._fused:
            return self._forward_fused(x, wts, bs)
        return self._forward_per_layer(x, wts, bs)

    def _forward_fused(self, x, wts, bs):
        dims, pdims = self.dims, self.pdims
        batch = x.shape[0]
        in_item = self.io_dtype.itemsize
        out_item = self.out_dtype.itemsize
        # Streamed VMEM per batch row: double-buffered in/out tiles + f32 temps.
        row_bytes = (2 * pdims[0] * in_item + 2 * pdims[3] * out_item
                     + 4 * (pdims[1] + pdims[2] + pdims[3]))
        tb = _choose_tb(batch, row_bytes, _ACT_VMEM_BUDGET)
        b_pad = _round_up(batch, tb)

        x_p = jnp.pad(x.astype(self.io_dtype),
                      ((0, b_pad - batch), (0, pdims[0] - dims[0])))

        kernel = functools.partial(_fused_kernel, skip_flags=self.skip_flags,
                                   mxu_dtype=self.mxu_dtype)
        in_specs = [pl.BlockSpec((tb, pdims[0]), lambda i: (i, 0))]
        for w, b in zip(wts, bs):
            in_specs.append(_resident_spec(w.shape))
            in_specs.append(_resident_spec(b.shape))
        out_specs = pl.BlockSpec((tb, pdims[3]), lambda i: (i, 0))

        flops = 2 * b_pad * sum(pdims[i] * pdims[i + 1] for i in range(3))
        bytes_accessed = (int(x_p.size) * in_item + self._weight_bytes
                          + sum(int(b.size) * 4 for b in bs)
                          + b_pad * pdims[3] * out_item)
        vmem_need = (tb * row_bytes + self._weight_bytes
                     + sum(_SUBLANE * int(b.shape[1]) * 4 for b in bs))

        out_p = pl.pallas_call(
            kernel,
            out_shape=jax.ShapeDtypeStruct((b_pad, pdims[3]), self.out_dtype),
            grid=(b_pad // tb,),
            in_specs=in_specs,
            out_specs=out_specs,
            compiler_params=pltpu.CompilerParams(
                dimension_semantics=("parallel",),
                vmem_limit_bytes=_vmem_limit(vmem_need)),
            cost_estimate=pl.CostEstimate(flops=int(flops), transcendentals=0,
                                          bytes_accessed=int(bytes_accessed)),
        )(x_p, wts[0], bs[0], wts[1], bs[1], wts[2], bs[2])

        return out_p[:batch, :dims[3]]

    def _forward_per_layer(self, x, wts, bs):
        dims, pdims = self.dims, self.pdims
        batch = x.shape[0]
        in_item = self.io_dtype.itemsize
        out_item = self.out_dtype.itemsize

        row_bytes = _SUBLANE
        for li in range(3):
            tk = _pick_tile(pdims[li])
            tn = _pick_tile(pdims[li + 1])
            o_item = out_item if li == 2 else in_item
            rb = 2 * tk * in_item + 2 * tn * o_item + tn * 4
            if self.skip_flags[li] and li != 2:
                rb += 2 * tn * in_item
            row_bytes = max(row_bytes, rb)
        tb = _choose_tb(batch, row_bytes, _ACT_VMEM_BUDGET)
        b_pad = _round_up(batch, tb)

        h = jnp.pad(x.astype(self.io_dtype),
                    ((0, b_pad - batch), (0, pdims[0] - dims[0])))
        for li in range(3):
            is_last = li == 2
            res = h if (self.skip_flags[li] and not is_last) else None
            h = self._layer_call(
                h, wts[li], bs[li], res, tm=tb,
                tn=_pick_tile(pdims[li + 1]), tk=_pick_tile(pdims[li]),
                out_dtype=self.out_dtype if is_last else self.io_dtype)
        return h[:batch, :dims[3]]

    @staticmethod
    def _layer_call(x_p, w_p, b_p, res_p, *, tm, tn, tk, out_dtype):
        M, K = x_p.shape
        N = w_p.shape[1]
        grid = (M // tm, N // tn, K // tk)
        in_specs = [pl.BlockSpec((tm, tk), lambda i, j, k: (i, k)),
                    pl.BlockSpec((tk, tn), lambda i, j, k: (k, j)),
                    pl.BlockSpec((1, tn), lambda i, j, k: (0, j))]
        args = [x_p, w_p, b_p]
        kernel = _layer_kernel
        if res_p is not None:
            in_specs.append(pl.BlockSpec((tm, tn), lambda i, j, k: (i, j)))
            args.append(res_p)
            kernel = _layer_kernel_res

        x_item = jnp.dtype(x_p.dtype).itemsize
        w_item = jnp.dtype(w_p.dtype).itemsize
        o_item = jnp.dtype(out_dtype).itemsize
        vmem_need = (2 * tm * tk * x_item + 2 * tk * tn * w_item
                     + 2 * _SUBLANE * tn * 4 + 2 * tm * tn * o_item
                     + tm * tn * 4)
        if res_p is not None:
            vmem_need += 2 * tm * tn * x_item

        return pl.pallas_call(
            kernel,
            out_shape=jax.ShapeDtypeStruct((M, N), out_dtype),
            grid=grid,
            in_specs=in_specs,
            out_specs=pl.BlockSpec((tm, tn), lambda i, j, k: (i, j)),
            scratch_shapes=[pltpu.VMEM((tm, tn), jnp.float32)],
            compiler_params=pltpu.CompilerParams(
                dimension_semantics=("parallel", "parallel", "arbitrary"),
                vmem_limit_bytes=_vmem_limit(vmem_need)),
        )(*args)


def dummy_skip_connection_network(x, params, use_shortcut=True, **kwargs):
    """One-shot functional wrapper (builds the net and calls it once)."""
    return PallasDummySkipConnectionNetwork(params, use_shortcut, **kwargs)(x)


# --------------------------- reference & test --------------------------------


def _reference(x, params, use_shortcut=True):
    """Pure-JAX reference mirroring the PyTorch forward exactly."""
    out = None
    for (w, b) in params:
        out = jnp.maximum(x @ jnp.asarray(w).T + jnp.asarray(b), 0.0)
        x = out + x if (use_shortcut and x.shape == out.shape) else out
    return out


def _make_params(layer_sizes, keys):
    params = []
    for i in range(3):
        fan_in, fan_out = layer_sizes[i], layer_sizes[i + 1]
        bound = 1.0 / (fan_in ** 0.5)
        w = jax.random.uniform(keys[2 * i], (fan_out, fan_in),
                               minval=-bound, maxval=bound, dtype=jnp.float32)
        b = jax.random.uniform(keys[2 * i + 1], (fan_out,),
                               minval=-bound, maxval=bound, dtype=jnp.float32)
        params.append((w, b))
    return params


if __name__ == "__main__":
    key = jax.random.PRNGKey(0)
    keys = jax.random.split(key, 10)

    # Case 1: all skips active, strict f32 MXU path (fused, VMEM-resident weights).
    sizes1 = [32, 32, 32, 32]
    params1 = _make_params(sizes1, keys[:6])
    x1 = jax.random.normal(keys[6], (8, sizes1[0]), dtype=jnp.float32)
    net1 = PallasDummySkipConnectionNetwork(params1, use_shortcut=True,
                                            mxu_dtype=jnp.float32)
    out1 = jax.block_until_ready(net1(x1))
    ref1 = _reference(x1, params1, True)
    assert out1.shape == (8, sizes1[3])
    assert jnp.allclose(out1, ref1, atol=1e-5, rtol=1e-5), "f32 fused mismatch"

    # Case 2: default bf16 MXU / bf16-streamed activations (fast path on all chips).
    net1_bf16 = PallasDummySkipConnectionNetwork(params1, use_shortcut=True)
    out1_bf16 = jax.block_until_ready(net1_bf16(x1))
    assert jnp.allclose(out1_bf16, ref1, atol=5e-2, rtol=5e-2), "bf16 fused mismatch"

    # Case 3: mixed feature sizes -> skips only where ORIGINAL shapes match.
    sizes2 = [32, 64, 64, 32]
    params2 = _make_params(sizes2, keys[:6])
    x2 = jax.random.normal(keys[7], (8, sizes2[0]), dtype=jnp.float32)
    net2 = PallasDummySkipConnectionNetwork(params2, use_shortcut=True,
                                            mxu_dtype=jnp.float32)
    out2 = jax.block_until_ready(net2(x2))
    ref2 = _reference(x2, params2, True)
    assert jnp.allclose(out2, ref2, atol=1e-5, rtol=1e-5), "mixed-dim mismatch"

    # Case 4: large-D fallback (tiled per-layer pallas_calls), forced here on
    # small dims so the path is exercised; batch=32 -> 2 batch tiles.
    sizes3 = [64, 64, 64, 32]
    params3 = _make_params(sizes3, keys[:6])
    x3 = jax.random.normal(keys[8], (32, sizes3[0]), dtype=jnp.float32)
    net3 = PallasDummySkipConnectionNetwork(params3, use_shortcut=True,
                                            mxu_dtype=jnp.float32,
                                            force_per_layer=True)
    out3 = jax.block_until_ready(net3(x3))
    ref3 = _reference(x3, params3, True)
    assert out3.shape == (32, sizes3[3])
    assert jnp.allclose(out3, ref3, atol=1e-5, rtol=1e-5), "per-layer mismatch"

    print("KERNEL_OK")
</pallas_src>

<mosaic_0001>
module attributes {stable_mosaic.version = 11 : i64} {
  func.func @_fused_kernel(%arg0: i32, %arg1: memref<8x128xf32, #tpu.memory_space<vmem>>, %arg2: memref<128x128xf32, #tpu.memory_space<vmem>>, %arg3: memref<1x128xf32, #tpu.memory_space<vmem>>, %arg4: memref<128x128xf32, #tpu.memory_space<vmem>>, %arg5: memref<1x128xf32, #tpu.memory_space<vmem>>, %arg6: memref<128x128xf32, #tpu.memory_space<vmem>>, %arg7: memref<1x128xf32, #tpu.memory_space<vmem>>, %arg8: memref<8x128xf32, #tpu.memory_space<vmem>>) attributes {dimension_semantics = [#tpu.dimension_semantics<parallel>], iteration_bounds = array<i64: 1>, scalar_prefetch = 0 : i64, scratch_operands = 0 : i64, tpu.core_type = #tpu.core_type<tc>, window_params = [{transform_indices = @transform_0, window_bounds = array<i64: 8, 128>}, {pipeline_mode = #tpu.pipeline_mode<synchronous>, transform_indices = @transform_1, window_bounds = array<i64: 128, 128>}, {pipeline_mode = #tpu.pipeline_mode<synchronous>, transform_indices = @transform_2, window_bounds = array<i64: 1, 128>}, {pipeline_mode = #tpu.pipeline_mode<synchronous>, transform_indices = @transform_3, window_bounds = array<i64: 128, 128>}, {pipeline_mode = #tpu.pipeline_mode<synchronous>, transform_indices = @transform_4, window_bounds = array<i64: 1, 128>}, {pipeline_mode = #tpu.pipeline_mode<synchronous>, transform_indices = @transform_5, window_bounds = array<i64: 128, 128>}, {pipeline_mode = #tpu.pipeline_mode<synchronous>, transform_indices = @transform_6, window_bounds = array<i64: 1, 128>}, {transform_indices = @transform_7, window_bounds = array<i64: 8, 128>}]} {
    %c0 = arith.constant 0 : index
    %c0_0 = arith.constant 0 : index
    %0 = vector.load %arg1[%c0, %c0_0] : memref<8x128xf32, #tpu.memory_space<vmem>>, vector<8x128xf32>
    %c0_1 = arith.constant 0 : index
    %c0_2 = arith.constant 0 : index
    %1 = vector.load %arg2[%c0_1, %c0_2] : memref<128x128xf32, #tpu.memory_space<vmem>>, vector<128x128xf32>
    %cst = arith.constant dense<0.000000e+00> : vector<8x128xf32>
    %2 = tpu.matmul %0, %1, %cst {dimension_numbers = #tpu.dot_dimension_numbers<[1], [0], [0], [1], [0, 0, 1, 1], [], []>} : vector<8x128xf32>, vector<128x128xf32>, vector<8x128xf32> -> vector<8x128xf32>
    %c0_3 = arith.constant 0 : index
    %c0_4 = arith.constant 0 : index
    %3 = vector.load %arg3[%c0_3, %c0_4] : memref<1x128xf32, #tpu.memory_space<vmem>>, vector<1x128xf32>
    %4 = vector.broadcast %3 : vector<1x128xf32> to vector<8x128xf32>
    %5 = arith.addf %2, %4 : vector<8x128xf32>
    %cst_5 = arith.constant 0.000000e+00 : f32
    %6 = vector.broadcast %cst_5 : f32 to vector<8x128xf32>
    %7 = arith.maximumf %5, %6 : vector<8x128xf32>
    %8 = arith.addf %7, %0 : vector<8x128xf32>
    %c0_6 = arith.constant 0 : index
    %c0_7 = arith.constant 0 : index
    %9 = vector.load %arg4[%c0_6, %c0_7] : memref<128x128xf32, #tpu.memory_space<vmem>>, vector<128x128xf32>
    %cst_8 = arith.constant dense<0.000000e+00> : vector<8x128xf32>
    %10 = tpu.matmul %8, %9, %cst_8 {dimension_numbers = #tpu.dot_dimension_numbers<[1], [0], [0], [1], [0, 0, 1, 1], [], []>} : vector<8x128xf32>, vector<128x128xf32>, vector<8x128xf32> -> vector<8x128xf32>
    %c0_9 = arith.constant 0 : index
    %c0_10 = arith.constant 0 : index
    %11 = vector.load %arg5[%c0_9, %c0_10] : memref<1x128xf32, #tpu.memory_space<vmem>>, vector<1x128xf32>
    %12 = vector.broadcast %11 : vector<1x128xf32> to vector<8x128xf32>
    %13 = arith.addf %10, %12 : vector<8x128xf32>
    %cst_11 = arith.constant 0.000000e+00 : f32
    %14 = vector.broadcast %cst_11 : f32 to vector<8x128xf32>
    %15 = arith.maximumf %13, %14 : vector<8x128xf32>
    %16 = arith.addf %15, %8 : vector<8x128xf32>
    %c0_12 = arith.constant 0 : index
    %c0_13 = arith.constant 0 : index
    %17 = vector.load %arg6[%c0_12, %c0_13] : memref<128x128xf32, #tpu.memory_space<vmem>>, vector<128x128xf32>
    %cst_14 = arith.constant dense<0.000000e+00> : vector<8x128xf32>
    %18 = tpu.matmul %16, %17, %cst_14 {dimension_numbers = #tpu.dot_dimension_numbers<[1], [0], [0], [1], [0, 0, 1, 1], [], []>} : vector<8x128xf32>, vector<128x128xf32>, vector<8x128xf32> -> vector<8x128xf32>
    %c0_15 = arith.constant 0 : index
    %c0_16 = arith.constant 0 : index
    %19 = vector.load %arg7[%c0_15, %c0_16] : memref<1x128xf32, #tpu.memory_space<vmem>>, vector<1x128xf32>
    %20 = vector.broadcast %19 : vector<1x128xf32> to vector<8x128xf32>
    %21 = arith.addf %18, %20 : vector<8x128xf32>
    %cst_17 = arith.constant 0.000000e+00 : f32
    %22 = vector.broadcast %cst_17 : f32 to vector<8x128xf32>
    %23 = arith.maximumf %21, %22 : vector<8x128xf32>
    %c0_18 = arith.constant 0 : index
    %c0_19 = arith.constant 0 : index
    %24 = vector.load %arg8[%c0_18, %c0_19] : memref<8x128xf32, #tpu.memory_space<vmem>>, vector<8x128xf32>
    tpu.vector_store %arg8[%c0_18, %c0_19], %23 {strides = array<i32>} : memref<8x128xf32, #tpu.memory_space<vmem>>, vector<8x128xf32>,
    return
  }
  func.func @transform_0(%arg0: i32) -> (i32, i32) {
    %c0_i32 = arith.constant 0 : i32
    %c0_i32_0 = arith.constant 0 : i32
    return %arg0, %c0_i32 : i32, i32
  }
  func.func @transform_1(%arg0: i32) -> (i32, i32) {
    %c0_i32 = arith.constant 0 : i32
    %c0_i32_0 = arith.constant 0 : i32
    %c0_i32_1 = arith.constant 0 : i32
    return %c0_i32, %c0_i32_0 : i32, i32
  }
  func.func @transform_2(%arg0: i32) -> (i32, i32) {
    %c0_i32 = arith.constant 0 : i32
    %c0_i32_0 = arith.constant 0 : i32
    %c0_i32_1 = arith.constant 0 : i32
    return %c0_i32, %c0_i32_0 : i32, i32
  }
  func.func @transform_3(%arg0: i32) -> (i32, i32) {
    %c0_i32 = arith.constant 0 : i32
    %c0_i32_0 = arith.constant 0 : i32
    %c0_i32_1 = arith.constant 0 : i32
    return %c0_i32, %c0_i32_0 : i32, i32
  }
  func.func @transform_4(%arg0: i32) -> (i32, i32) {
    %c0_i32 = arith.constant 0 : i32
    %c0_i32_0 = arith.constant 0 : i32
    %c0_i32_1 = arith.constant 0 : i32
    return %c0_i32, %c0_i32_0 : i32, i32
  }
  func.func @transform_5(%arg0: i32) -> (i32, i32) {
    %c0_i32 = arith.constant 0 : i32
    %c0_i32_0 = arith.constant 0 : i32
    %c0_i32_1 = arith.constant 0 : i32
    return %c0_i32, %c0_i32_0 : i32, i32
  }
  func.func @transform_6(%arg0: i32) -> (i32, i32) {
    %c0_i32 = arith.constant 0 : i32
    %c0_i32_0 = arith.constant 0 : i32
    %c0_i32_1 = arith.constant 0 : i32
    return %c0_i32, %c0_i32_0 : i32, i32
  }
  func.func @transform_7(%arg0: i32) -> (i32, i32) {
    %c0_i32 = arith.constant 0 : i32
    %c0_i32_0 = arith.constant 0 : i32
    return %arg0, %c0_i32 : i32, i32
  }
}

</mosaic_0001>

<bundles_post_ra>
// kernel: _forward.1
= control target key start
LH: loop header
LB: loop body
LE: loop exit
PB: predicated region body
PF: predicated region fallthrough
CT: control target
= control target key end

     0   :  { %12 = vsyncpa [#allocation3], 0  ;;  %s749_s0 = inlined_call_operand.vmem [shape: f32[8,128], index: 0, kind: input, shape index: {}]   ;;  %s750_s1 = inlined_call_operand.hbm [shape: f32[128,128], index: 1, kind: input, shape index: {}]   ;;  %s751_s2 = inlined_call_operand.vmem [shape: f32[1,128], index: 2, kind: input, shape index: {}]   ;;  %s752_s3 = inlined_call_operand.hbm [shape: f32[128,128], index: 3, kind: input, shape index: {}]   ;;  %s753_s4 = inlined_call_operand.vmem [shape: f32[1,128], index: 4, kind: input, shape index: {}]   ;;  %s754_s5 = inlined_call_operand.hbm [shape: f32[128,128], index: 5, kind: input, shape index: {}]   ;;  %s755_s6 = inlined_call_operand.vmem [shape: f32[1,128], index: 6, kind: input, shape index: {}]   ;;  %s756_s7 = inlined_call_operand.hbm [shape: f32[8,128], index: 7, kind: output, shape index: {}]  }
   0x1   :  { %13 = vsyncpa [#allocation6], 0 }
   0x2   :  { %14 = vsyncpa [#allocation4], 0  ;;  %s623_s24 = smov [#allocation5]   ;;  %s624_s26 = smov [#allocation2]  }
   0x3   :  { %s36_s25 = sshll.u32 %s623_s24, 4  ;;  %s22_s27 = sshll.u32 %s624_s26, 4  ;;  %s37_s25 = int_to_ptr.vmem [resolvable:$true] %s36_s25  ;;  %s23_s27 = int_to_ptr.vmem [resolvable:$true] %s22_s27 }
   0x4   :  { %s545_s28 = scalar_lea.vmem %s37_s25, 2048  ;;  %p550_p1 = scmp.lt.s32.totalorder %s37_s25, %s37_s25 }
   0x5   :  { %p546_p0 = scmp.ne.s32.totalorder %s37_s25, %s545_s28  ;;  %p551_p2 = scmp.lt.s32.totalorder %s545_s28, %s545_s28 }
   0x7   :  { %p552_p3 = por %p551_p2, %p550_p1 }
   0x9   :  { %p553_p4 = pnand %p552_p3, %p546_p0 }
   0xb   :  { %556 = shalt.err (!%p553_p4)
}
   0xc   :  { %s625_s29 = smov 128   ;;  %s626_s30 = smov 8  }
   0xd   :  { %42 = dma.hbm_to_vmem [thread:$0]  %s752_s3, 2048, %s37_s25, [#allocation6], %s625_s29, %s625_s29, %s626_s30  }
   0xe   :  { %s565_s10 = scalar_lea.vmem %s23_s27, 2048  ;;  %p570_p6 = scmp.lt.s32.totalorder %s23_s27, %s23_s27 }
   0xf   :  { %p566_p5 = scmp.ne.s32.totalorder %s23_s27, %s565_s10  ;;  %p571_p7 = scmp.lt.s32.totalorder %s565_s10, %s565_s10 }
  0x11   :  { %p572_p8 = por %p571_p7, %p570_p6 }
  0x13   :  { %p573_p9 = pnand %p572_p8, %p566_p5 }
  0x15   :  { %576 = shalt.err (!%p573_p9)
}
  0x16   :  { %28 = dma.hbm_to_vmem [thread:$0]  %s750_s1, 2048, %s23_s27, [#allocation3], %s625_s29, %s625_s29, %s626_s30  }
  0x17   :  { %s627_s13 = smov [#allocation7]  }
  0x18   :  { %s50_s14 = sshll.u32 %s627_s13, 4  ;;  %s51_s14 = int_to_ptr.vmem [resolvable:$true] %s50_s14 }
  0x19   :  { %s585_s15 = scalar_lea.vmem %s51_s14, 2048  ;;  %p590_p11 = scmp.lt.s32.totalorder %s51_s14, %s51_s14 }
  0x1a   :  { %p586_p10 = scmp.ne.s32.totalorder %s51_s14, %s585_s15  ;;  %p591_p12 = scmp.lt.s32.totalorder %s585_s15, %s585_s15 }
  0x1c   :  { %p592_p13 = por %p591_p12, %p590_p11 }
  0x1e   :  { %p593_p0 = pnand %p592_p13, %p586_p10 }
  0x20   :  { %596 = shalt.err (!%p593_p0)
}
  0x21   :  { %56 = dma.hbm_to_vmem [thread:$0]  %s754_s5, 2048, %s51_s14, [#allocation6], %s625_s29, %s625_s29, %s626_s30  }
  0x22   :  { %617 = dma.done.wait [#allocation3], 2048  }
  0x23   :  { %618 = vsyncadd [#allocation3], 4294965248 }
  0x24   :  { %619 = dma.done.wait [#allocation6], 4096  }
  0x25   :  { %620 = vsyncadd [#allocation6], 4294963200  ;;  %v628_v0 = vmov 0.0   ;;  %vm629_vm0 = vmmov 0   ;;  %v84_v1 = vld [vmem:[#allocation2 + $0x78] sm:$0xff]  ;;  %v83_v2 = vld [vmem:[#allocation2 + $0x70] sm:$0xff] }
  0x26   :  { %424 = vmatprep.subr.mxu0 %v628_v0  ;;  %456 = vmatprep.mubr.msk.f32.mxu0 %vm629_vm0, %v628_v0  ;;  %v82_v3 = vld [vmem:[#allocation2 + $0x68] sm:$0xff]  ;;  %v81_v4 = vld [vmem:[#allocation2 + $0x60] sm:$0xff]  ;;  %v179_v5 = vld [vmem:[#allocation5 + $0x78] sm:$0xff]  ;;  %s630_s21 = smov [#allocation8]  }
  0x27   :  { %459 = vmatprep.subr.mxu1 %v628_v0  ;;  %491 = vmatprep.mubr.msk.f32.mxu1 %vm629_vm0, %v628_v0  ;;  %v80_v6 = vld [vmem:[#allocation2 + $0x58] sm:$0xff]  ;;  %v178_v7 = vld [vmem:[#allocation5 + $0x70] sm:$0xff]  ;;  %v177_v8 = vld [vmem:[#allocation5 + $0x68] sm:$0xff]  ;;  %s360_s22 = sshll.u32 %s630_s21, 4  ;;  %s361_s22 = int_to_ptr.vmem [resolvable:$true] %s360_s22 }
  0x28   :  { %425 = vmatpush3.msra.mxu0 %v84_v1  ;;  %460 = vmatpush3.msra.mxu1 %v179_v5  ;;  %v79_v9 = vld [vmem:[#allocation2 + $0x50] sm:$0xff]  ;;  %v176_v10 = vld [vmem:[#allocation5 + $0x60] sm:$0xff]  ;;  %v78_v11 = vld [vmem:[#allocation2 + $0x48] sm:$0xff]  ;;  %s597_s23 = scalar_lea.vmem %s361_s22, 128  ;;  %p602_p2 = scmp.lt.s32.totalorder %s361_s22, %s361_s22 }
  0x29   :  { %426 = vmatprep.subr.mxu0 %v628_v0  ;;  %461 = vmatprep.subr.mxu1 %v628_v0  ;;  %v175_v12 = vld [vmem:[#allocation5 + $0x58] sm:$0xff]  ;;  %v77_v13 = vld [vmem:[#allocation2 + $0x40] sm:$0xff]  ;;  %v174_v14 = vld [vmem:[#allocation5 + $0x50] sm:$0xff]  ;;  %p598_p1 = scmp.ne.s32.totalorder %s361_s22, %s597_s23  ;;  %p603_p3 = scmp.lt.s32.totalorder %s597_s23, %s597_s23 }
  0x2a   :  { %427 = vmatpush3.msra.mxu0 %v83_v2  ;;  %462 = vmatpush3.msra.mxu1 %v178_v7  ;;  %v76_v15 = vld [vmem:[#allocation2 + $0x38] sm:$0xff]  ;;  %v173_v16 = vld [vmem:[#allocation5 + $0x48] sm:$0xff]  ;;  %v75_v17 = vld [vmem:[#allocation2 + $0x30] sm:$0xff] }
  0x2b   :  { %428 = vmatprep.subr.mxu0 %v628_v0  ;;  %463 = vmatprep.subr.mxu1 %v628_v0  ;;  %v172_v18 = vld [vmem:[#allocation5 + $0x40] sm:$0xff]  ;;  %v74_v19 = vld [vmem:[#allocation2 + $0x28] sm:$0xff]  ;;  %v171_v20 = vld [vmem:[#allocation5 + $0x38] sm:$0xff]  ;;  %p604_p4 = por %p603_p3, %p602_p2 }
  0x2c   :  { %429 = vmatpush3.msra.mxu0 %v82_v3  ;;  %464 = vmatpush3.msra.mxu1 %v177_v8  ;;  %v73_v21 = vld [vmem:[#allocation2 + $0x20] sm:$0xff]  ;;  %v170_v22 = vld [vmem:[#allocation5 + $0x30] sm:$0xff]  ;;  %v72_v23 = vld [vmem:[#allocation2 + $0x18] sm:$0xff] }
  0x2d   :  { %430 = vmatprep.subr.mxu0 %v628_v0  ;;  %465 = vmatprep.subr.mxu1 %v628_v0  ;;  %v169_v24 = vld [vmem:[#allocation5 + $0x28] sm:$0xff]  ;;  %v71_v25 = vld [vmem:[#allocation2 + $0x10] sm:$0xff]  ;;  %v168_v26 = vld [vmem:[#allocation5 + $0x20] sm:$0xff]  ;;  %p605_p5 = pnand %p604_p4, %p598_p1 }
  0x2e   :  { %431 = vmatpush3.msra.mxu0 %v81_v4  ;;  %466 = vmatpush3.msra.mxu1 %v176_v10  ;;  %v70_v27 = vld [vmem:[#allocation2 + $0x8] sm:$0xff]  ;;  %v69_v28 = vld [vmem:[#allocation2] sm:$0xff]  ;;  %v167_v30 = vld [vmem:[#allocation5 + $0x18] sm:$0xff] }
  0x2f   :  { %432 = vmatprep.subr.mxu0 %v628_v0  ;;  %467 = vmatprep.subr.mxu1 %v628_v0  ;;  %v68_v29 = vld [vmem:[%s749_s0] sm:$0xff]  ;;  %v166_v31 = vld [vmem:[#allocation5 + $0x10] sm:$0xff]  ;;  %v165_v32 = vld [vmem:[#allocation5 + $0x8] sm:$0xff] }
  0x30   :  { %433 = vmatpush3.msra.mxu0 %v80_v6  ;;  %468 = vmatpush3.msra.mxu1 %v175_v12  ;;  %v164_v33 = vld [vmem:[#allocation5] sm:$0xff]  ;;  %v274_v34 = vld [vmem:[#allocation7 + $0x78] sm:$0xff]  ;;  %v273_v35 = vld [vmem:[#allocation7 + $0x70] sm:$0xff] }
  0x31   :  { %434 = vmatprep.subr.mxu0 %v628_v0  ;;  %469 = vmatprep.subr.mxu1 %v628_v0  ;;  %v272_v36 = vld [vmem:[#allocation7 + $0x68] sm:$0xff]  ;;  %v271_v37 = vld [vmem:[#allocation7 + $0x60] sm:$0xff]  ;;  %v270_v38 = vld [vmem:[#allocation7 + $0x58] sm:$0xff] }
  0x32   :  { %435 = vmatpush3.msra.mxu0 %v79_v9  ;;  %470 = vmatpush3.msra.mxu1 %v174_v14  ;;  %v269_v39 = vld [vmem:[#allocation7 + $0x50] sm:$0xff]  ;;  %v268_v40 = vld [vmem:[#allocation7 + $0x48] sm:$0xff]  ;;  %v267_v41 = vld [vmem:[#allocation7 + $0x40] sm:$0xff] }
  0x33   :  { %436 = vmatprep.subr.mxu0 %v628_v0  ;;  %471 = vmatprep.subr.mxu1 %v628_v0  ;;  %v266_v42 = vld [vmem:[#allocation7 + $0x38] sm:$0xff]  ;;  %v265_v43 = vld [vmem:[#allocation7 + $0x30] sm:$0xff]  ;;  %v264_v44 = vld [vmem:[#allocation7 + $0x28] sm:$0xff] }
  0x34   :  { %437 = vmatpush3.msra.mxu0 %v78_v11  ;;  %472 = vmatpush3.msra.mxu1 %v173_v16  ;;  %v263_v45 = vld [vmem:[#allocation7 + $0x20] sm:$0xff]  ;;  %v262_v52 = vld [vmem:[#allocation7 + $0x18] sm:$0xff]  ;;  %v261_v53 = vld [vmem:[#allocation7 + $0x10] sm:$0xff] }
  0x35   :  { %438 = vmatprep.subr.mxu0 %v628_v0  ;;  %473 = vmatprep.subr.mxu1 %v628_v0  ;;  %v370_v46 = vld [vmem:[%s751_s2] ss:$0 sm:$0xff]  ;;  %v260_v54 = vld [vmem:[#allocation7 + $0x8] sm:$0xff] }
  0x36   :  { %439 = vmatpush3.msra.mxu0 %v77_v13  ;;  %474 = vmatpush3.msra.mxu1 %v172_v18  ;;  %v259_v55 = vld [vmem:[#allocation7] sm:$0xff] }
  0x37   :  { %440 = vmatprep.subr.mxu0 %v628_v0  ;;  %475 = vmatprep.subr.mxu1 %v628_v0  ;;  %v371_v56 = vld [vmem:[%s753_s4] ss:$0 sm:$0xff] }
  0x38   :  { %441 = vmatpush3.msra.mxu0 %v76_v15  ;;  %476 = vmatpush3.msra.mxu1 %v171_v20  ;;  %v372_v62 = vld [vmem:[%s755_s6] ss:$0 sm:$0xff] }
  0x39   :  { %442 = vmatprep.subr.mxu0 %v628_v0  ;;  %477 = vmatprep.subr.mxu1 %v628_v0 }
  0x3a   :  { %443 = vmatpush3.msra.mxu0 %v75_v17  ;;  %478 = vmatpush3.msra.mxu1 %v170_v22 }
  0x3b   :  { %444 = vmatprep.subr.mxu0 %v628_v0  ;;  %479 = vmatprep.subr.mxu1 %v628_v0 }
  0x3c   :  { %445 = vmatpush3.msra.mxu0 %v74_v19  ;;  %480 = vmatpush3.msra.mxu1 %v169_v24 }
  0x3d   :  { %446 = vmatprep.subr.mxu0 %v628_v0  ;;  %481 = vmatprep.subr.mxu1 %v628_v0 }
  0x3e   :  { %447 = vmatpush3.msra.mxu0 %v73_v21  ;;  %482 = vmatpush3.msra.mxu1 %v168_v26 }
  0x3f   :  { %448 = vmatprep.subr.mxu0 %v628_v0  ;;  %483 = vmatprep.subr.mxu1 %v628_v0 }
  0x40   :  { %449 = vmatpush3.msra.mxu0 %v72_v23  ;;  %484 = vmatpush3.msra.mxu1 %v167_v30 }
  0x41   :  { %450 = vmatprep.subr.mxu0 %v628_v0  ;;  %485 = vmatprep.subr.mxu1 %v628_v0 }
  0x42   :  { %451 = vmatpush3.msra.mxu0 %v71_v25  ;;  %486 = vmatpush3.msra.mxu1 %v166_v31 }
  0x43   :  { %452 = vmatprep.subr.mxu0 %v628_v0  ;;  %487 = vmatprep.subr.mxu1 %v628_v0 }
  0x44   :  { %453 = vmatpush3.msra.mxu0 %v70_v27  ;;  %488 = vmatpush3.msra.mxu1 %v165_v32 }
  0x45   :  { %454 = vmatprep.subr.mxu0 %v628_v0  ;;  %489 = vmatprep.subr.mxu1 %v628_v0 }
  0x46   :  { %455 = vmatpush3.msra.mxu0 %v69_v28  ;;  %490 = vmatpush3.msra.mxu1 %v164_v33 }
  0x47   :  { %457 = vmatmul.mubr.f32.vlgmr.msra.gmra.mxu0 %v68_v29  ;;  %494 = vmatprep.subr.mxu0 %v628_v0 }
  0x48   :  { %526 = vmatprep.mubr.msk.f32.mxu0 %vm629_vm0, %v628_v0  ;;  %495 = vmatpush3.msra.mxu0 %v274_v34 }
  0x49   :  { %496 = vmatprep.subr.mxu0 %v628_v0 }
  0x4a   :  { %497 = vmatpush3.msra.mxu0 %v273_v35 }
  0x4b   :  { %498 = vmatprep.subr.mxu0 %v628_v0 }
  0x4c   :  { %499 = vmatpush3.msra.mxu0 %v272_v36 }
  0x4d   :  { %500 = vmatprep.subr.mxu0 %v628_v0 }
  0x4e   :  { %501 = vmatpush3.msra.mxu0 %v271_v37 }
  0x4f   :  { %502 = vmatprep.subr.mxu0 %v628_v0 }
  0x50   :  { %503 = vmatpush3.msra.mxu0 %v270_v38 }
  0x51   :  { %504 = vmatprep.subr.mxu0 %v628_v0 }
  0x52   :  { %505 = vmatpush3.msra.mxu0 %v269_v39 }
  0x53   :  { %506 = vmatprep.subr.mxu0 %v628_v0 }
  0x54   :  { %507 = vmatpush3.msra.mxu0 %v268_v40 }
  0x55   :  { %508 = vmatprep.subr.mxu0 %v628_v0 }
  0x56   :  { %509 = vmatpush3.msra.mxu0 %v267_v41 }
  0x57   :  { %510 = vmatprep.subr.mxu0 %v628_v0 }
  0x58   :  { %511 = vmatpush3.msra.mxu0 %v266_v42 }
  0x59   :  { %512 = vmatprep.subr.mxu0 %v628_v0 }
  0x5a   :  { %513 = vmatpush3.msra.mxu0 %v265_v43 }
  0x5b   :  { %514 = vmatprep.subr.mxu0 %v628_v0 }
  0x5c   :  { %515 = vmatpush3.msra.mxu0 %v264_v44 }
  0x5d   :  { %516 = vmatprep.subr.mxu0 %v628_v0 }
  0x5e   :  { %517 = vmatpush3.msra.mxu0 %v263_v45 }
  0x5f   :  { %518 = vmatprep.subr.mxu0 %v628_v0 }
  0x60   :  { %519 = vmatpush3.msra.mxu0 %v262_v52 }
  0x61   :  { %520 = vmatprep.subr.mxu0 %v628_v0 }
  0x62   :  { %521 = vmatpush3.msra.mxu0 %v261_v53 }
  0x63   :  { %522 = vmatprep.subr.mxu0 %v628_v0 }
  0x64   :  { %523 = vmatpush3.msra.mxu0 %v260_v54 }
  0x65   :  { %524 = vmatprep.subr.mxu0 %v628_v0 }
  0x66   :  { %525 = vmatpush3.msra.mxu0 %v259_v55 }
 0x107   :  { %v158_v47 = vpop.f32.mrf.mxu0 }
 0x108   :  { %v159_v48 = vadd.f32 %v370_v46, %v158_v47 }
 0x109   :  { %v458_v49 = vpop.f32.mrf.mxu0 }
 0x10a   :  { %v162_v50 = vmax.f32 %v159_v48, 0.0 }
 0x10c   :  { %v163_v51 = vadd.f32 %v162_v50, %v68_v29 }
 0x10e   :  { %492 = vmatmul.mubr.f32.vlgmr.msra.gmra.mxu1 %v163_v51 }
 0x1ce   :  { %v253_v57 = vpop.f32.mrf.mxu1 }
 0x1cf   :  { %v254_v58 = vadd.f32 %v371_v56, %v253_v57 }
 0x1d0   :  { %v493_v59 = vpop.f32.mrf.mxu1 }
 0x1d1   :  { %v257_v60 = vmax.f32 %v254_v58, 0.0 }
 0x1d3   :  { %v258_v61 = vadd.f32 %v257_v60, %v163_v51 }
 0x1d5   :  { %527 = vmatmul.mubr.f32.vlgmr.msra.gmra.mxu0 %v258_v61 }
 0x295   :  { %v348_v63 = vpop.f32.mrf.mxu0 }
 0x296   :  { %v349_v0 = vadd.f32 %v372_v62, %v348_v63 }
 0x297   :  { %v528_v1 = vpop.f32.mrf.mxu0 }
 0x298   :  { %v352_v2 = vmax.f32 %v349_v0, 0.0 }
 0x29a   :  { %353 = vst [vmem:[#allocation8] sm:$0xff] %v352_v2 }
 0x29b   :  { %608 = shalt.err (!%p605_p5)
}
 0x29c   :  { %363 = dma.vmem_to_hbm [thread:$0]  %s361_s22, 128, %s756_s7, [#allocation4]  }
 0x29d   :  { %621 = dma.done.wait [#allocation4], 128  }
 0x29e   :  { %622 = vsyncadd [#allocation4], 4294967168 }
 0x29f   :  { %367 = vsyncpa [#allocation3], 1 }
 0x2a0   :  { %368 = vsyncpa [#allocation6], 1 }
 0x2a1   :  { %369 = vsyncpa [#allocation4], 1 }

</bundles_post_ra>
